<compile_context>
chip_gen: v6e
topology: v6e:2x2x1
jax: 0.10.0
libtpu: 0.0.40
codegen_flags: <defaults>
</compile_context>

<pallas_src>
import jax
import jax.numpy as jnp
from jax.experimental import pallas as pl
from jax.experimental.pallas import tpu as pltpu

INPUT_SIZE = 1
HIDDEN_SIZE = 5
OUTPUT_SIZE = 1

_SUBLANES = 8
_LANE_CANDIDATES = (512, 256, 128)      # widest lane width that divides B
_FALLBACK_LANES = 512
_TARGET_BLOCK_BYTES = 2 * 1024 * 1024   # ~2 MiB per block


def _mlp_kernel(x_ref, w1_ref, b1_ref, nw2_ref, nb2_ref, o_ref):
    # x_ref / o_ref: (block_rows, lanes) f32 VMEM tiles (lane-dense batch slab).
    # w1_ref, b1_ref, nw2_ref: (5,) f32 SMEM;  nb2_ref: (1,) f32 SMEM.
    # nw2 / nb2 are pre-negated, so the kernel accumulates -z directly.
    x = x_ref[...]

    # j = 0 term also folds in (-b2):  acc = -w2[0]*relu(w1[0]*x+b1[0]) - b2
    h = jnp.maximum(x * w1_ref[0] + b1_ref[0], 0.0)
    acc = nw2_ref[0] * h + nb2_ref[0]
    for j in range(1, HIDDEN_SIZE):
        h = jnp.maximum(x * w1_ref[j] + b1_ref[j], 0.0)
        acc = acc + nw2_ref[j] * h

    # acc == -z;  sigmoid(z) = 1 / (1 + exp(-z)):  exp (EUP) + approx recip (EUP).
    o_ref[...] = pl.reciprocal(1.0 + jnp.exp(acc), approx=True).astype(o_ref.dtype)


def _choose_block_rows(rows, lanes):
    """~2 MiB blocks, multiple of 8 sublanes, >= 2 grid steps when possible."""
    if rows <= _SUBLANES:
        return rows                                      # single full-array block
    target = max(_SUBLANES, _TARGET_BLOCK_BYTES // (lanes * 4))
    steps = max(2, min(4, rows // _SUBLANES))            # aim for 2..4 grid steps
    br = min(target, -(-rows // steps))
    br = max(_SUBLANES, -(-br // _SUBLANES) * _SUBLANES) # round up to sublanes
    return min(br, rows)


def customer_purchase_net(x, w1, b1, w2, b2):
    """Fused forward pass.

    Args:
      x:  (B, INPUT_SIZE) float32
      w1: (INPUT_SIZE, HIDDEN_SIZE) float32   (transposed vs. PyTorch storage)
      b1: (HIDDEN_SIZE,) float32
      w2: (HIDDEN_SIZE, OUTPUT_SIZE) float32  (transposed vs. PyTorch storage)
      b2: (OUTPUT_SIZE,) float32
    Returns:
      (B, OUTPUT_SIZE) float32 purchase probabilities in (0, 1).
    """
    B = x.shape[0]
    x_flat = x.reshape(-1).astype(jnp.float32)          # input_size == 1

    # ---- lane-dense slab layout -------------------------------------------
    lanes = next((w for w in _LANE_CANDIDATES if B % w == 0), None)
    if lanes is not None:
        # Fast path: layout-preserving reshape, zero extra HBM traffic.
        rows = B // lanes
        x2d = x_flat.reshape(rows, lanes)
        padded = False
    else:
        # Ragged batch: one pad copy in, one slice copy out.
        # TODO(synk): allow_input_fusion in pltpu.CompilerParams could let XLA
        # fuse this pad into the pallas_call and drop the extra HBM pass.
        lanes = _FALLBACK_LANES
        rows = -(-B // lanes)
        x2d = jnp.pad(x_flat, (0, rows * lanes - B)).reshape(rows, lanes)
        padded = True

    br = _choose_block_rows(rows, lanes)
    grid = (pl.cdiv(rows, br),)                          # ragged last block masked
    tile_spec = pl.BlockSpec((br, lanes), lambda i: (i, 0))
    smem_spec = pl.BlockSpec(memory_space=pltpu.MemorySpace.SMEM)

    out2d = pl.pallas_call(
        _mlp_kernel,
        out_shape=jax.ShapeDtypeStruct((rows, lanes), jnp.float32),
        grid=grid,
        in_specs=[tile_spec, smem_spec, smem_spec, smem_spec, smem_spec],
        out_specs=tile_spec,
        compiler_params=pltpu.CompilerParams(
            dimension_semantics=("parallel",)),
    )(
        x2d,
        w1.reshape(-1).astype(jnp.float32),     # (5,)
        b1.reshape(-1).astype(jnp.float32),     # (5,)
        (-w2).reshape(-1).astype(jnp.float32),  # (5,)  pre-negated
        (-b2).reshape(-1).astype(jnp.float32),  # (1,)  pre-negated
    )

    out_flat = out2d.reshape(-1)
    if padded:
        out_flat = out_flat[:B]
    return out_flat.reshape(B, OUTPUT_SIZE)


def _init_params(key):
    # Deterministic init mimicking PyTorch nn.Linear default:
    # U(-1/sqrt(fan_in), 1/sqrt(fan_in)) for weights and biases.
    k1, k2, k3, k4 = jax.random.split(key, 4)
    bound1 = 1.0 / (INPUT_SIZE ** 0.5)
    bound2 = 1.0 / (HIDDEN_SIZE ** 0.5)
    w1 = jax.random.uniform(k1, (INPUT_SIZE, HIDDEN_SIZE), jnp.float32,
                            minval=-bound1, maxval=bound1)
    b1 = jax.random.uniform(k2, (HIDDEN_SIZE,), jnp.float32,
                            minval=-bound1, maxval=bound1)
    w2 = jax.random.uniform(k3, (HIDDEN_SIZE, OUTPUT_SIZE), jnp.float32,
                            minval=-bound2, maxval=bound2)
    b2 = jax.random.uniform(k4, (OUTPUT_SIZE,), jnp.float32,
                            minval=-bound2, maxval=bound2)
    return w1, b1, w2, b2


def _reference(x, w1, b1, w2, b2):
    h = jnp.maximum(x @ w1 + b1, 0.0)
    return jax.nn.sigmoid(h @ w2 + b2)


if __name__ == "__main__":
    key = jax.random.PRNGKey(0)
    key_x, key_p = jax.random.split(key)
    w1, b1, w2, b2 = _init_params(key_p)

    def check(batch):
        xs = jax.random.normal(key_x, (batch, INPUT_SIZE), jnp.float32)
        out = jax.block_until_ready(customer_purchase_net(xs, w1, b1, w2, b2))
        ref = _reference(xs, w1, b1, w2, b2)
        assert out.shape == (batch, OUTPUT_SIZE)
        err = float(jnp.max(jnp.abs(out - ref)))
        assert jnp.allclose(out, ref, atol=2e-3, rtol=2e-3), err

    # Small batch: ragged fallback path (pad to one (1, 512) block).
    check(8)
    # Fast path, single full-array block (4096 = 8 rows x 512 lanes).
    check(4096)
    # Fast path, multi-step pipelined grid with a ragged last block
    # (20480 -> 40 rows x 512 lanes, 16-row blocks, 3 grid steps).
    check(20480)

    print("KERNEL_OK")
</pallas_src>

<mosaic_0001>
module attributes {stable_mosaic.version = 11 : i64} {
  func.func @_mlp_kernel(%arg0: i32, %arg1: memref<1x512xf32, #tpu.memory_space<vmem>>, %arg2: memref<5xf32, #tpu.memory_space<smem>>, %arg3: memref<5xf32, #tpu.memory_space<smem>>, %arg4: memref<5xf32, #tpu.memory_space<smem>>, %arg5: memref<1xf32, #tpu.memory_space<smem>>, %arg6: memref<1x512xf32, #tpu.memory_space<vmem>>) attributes {dimension_semantics = [#tpu.dimension_semantics<parallel>], iteration_bounds = array<i64: 1>, scalar_prefetch = 0 : i64, scratch_operands = 0 : i64, tpu.core_type = #tpu.core_type<tc>, window_params = [{transform_indices = @transform_0, window_bounds = array<i64: 1, 512>}, {transform_indices = @transform_1, window_bounds = array<i64: 5>}, {transform_indices = @transform_2, window_bounds = array<i64: 5>}, {transform_indices = @transform_3, window_bounds = array<i64: 5>}, {transform_indices = @transform_4, window_bounds = array<i64: 1>}, {transform_indices = @transform_5, window_bounds = array<i64: 1, 512>}]} {
    %c0 = arith.constant 0 : index
    %c0_0 = arith.constant 0 : index
    %0 = vector.load %arg1[%c0, %c0_0] : memref<1x512xf32, #tpu.memory_space<vmem>>, vector<1x512xf32>
    %c0_1 = arith.constant 0 : index
    %1 = memref.load %arg2[%c0_1] : memref<5xf32, #tpu.memory_space<smem>>
    %2 = vector.broadcast %1 : f32 to vector<1x512xf32>
    %3 = arith.mulf %0, %2 : vector<1x512xf32>
    %c0_2 = arith.constant 0 : index
    %4 = memref.load %arg3[%c0_2] : memref<5xf32, #tpu.memory_space<smem>>
    %5 = vector.broadcast %4 : f32 to vector<1x512xf32>
    %6 = arith.addf %3, %5 : vector<1x512xf32>
    %cst = arith.constant 0.000000e+00 : f32
    %7 = vector.broadcast %cst : f32 to vector<1x512xf32>
    %8 = arith.maximumf %6, %7 : vector<1x512xf32>
    %c0_3 = arith.constant 0 : index
    %9 = memref.load %arg4[%c0_3] : memref<5xf32, #tpu.memory_space<smem>>
    %10 = vector.broadcast %9 : f32 to vector<1x512xf32>
    %11 = arith.mulf %10, %8 : vector<1x512xf32>
    %c0_4 = arith.constant 0 : index
    %12 = memref.load %arg5[%c0_4] : memref<1xf32, #tpu.memory_space<smem>>
    %13 = vector.broadcast %12 : f32 to vector<1x512xf32>
    %14 = arith.addf %11, %13 : vector<1x512xf32>
    %c1 = arith.constant 1 : index
    %15 = memref.load %arg2[%c1] : memref<5xf32, #tpu.memory_space<smem>>
    %16 = vector.broadcast %15 : f32 to vector<1x512xf32>
    %17 = arith.mulf %0, %16 : vector<1x512xf32>
    %c1_5 = arith.constant 1 : index
    %18 = memref.load %arg3[%c1_5] : memref<5xf32, #tpu.memory_space<smem>>
    %19 = vector.broadcast %18 : f32 to vector<1x512xf32>
    %20 = arith.addf %17, %19 : vector<1x512xf32>
    %cst_6 = arith.constant 0.000000e+00 : f32
    %21 = vector.broadcast %cst_6 : f32 to vector<1x512xf32>
    %22 = arith.maximumf %20, %21 : vector<1x512xf32>
    %c1_7 = arith.constant 1 : index
    %23 = memref.load %arg4[%c1_7] : memref<5xf32, #tpu.memory_space<smem>>
    %24 = vector.broadcast %23 : f32 to vector<1x512xf32>
    %25 = arith.mulf %24, %22 : vector<1x512xf32>
    %26 = arith.addf %14, %25 : vector<1x512xf32>
    %c2 = arith.constant 2 : index
    %27 = memref.load %arg2[%c2] : memref<5xf32, #tpu.memory_space<smem>>
    %28 = vector.broadcast %27 : f32 to vector<1x512xf32>
    %29 = arith.mulf %0, %28 : vector<1x512xf32>
    %c2_8 = arith.constant 2 : index
    %30 = memref.load %arg3[%c2_8] : memref<5xf32, #tpu.memory_space<smem>>
    %31 = vector.broadcast %30 : f32 to vector<1x512xf32>
    %32 = arith.addf %29, %31 : vector<1x512xf32>
    %cst_9 = arith.constant 0.000000e+00 : f32
    %33 = vector.broadcast %cst_9 : f32 to vector<1x512xf32>
    %34 = arith.maximumf %32, %33 : vector<1x512xf32>
    %c2_10 = arith.constant 2 : index
    %35 = memref.load %arg4[%c2_10] : memref<5xf32, #tpu.memory_space<smem>>
    %36 = vector.broadcast %35 : f32 to vector<1x512xf32>
    %37 = arith.mulf %36, %34 : vector<1x512xf32>
    %38 = arith.addf %26, %37 : vector<1x512xf32>
    %c3 = arith.constant 3 : index
    %39 = memref.load %arg2[%c3] : memref<5xf32, #tpu.memory_space<smem>>
    %40 = vector.broadcast %39 : f32 to vector<1x512xf32>
    %41 = arith.mulf %0, %40 : vector<1x512xf32>
    %c3_11 = arith.constant 3 : index
    %42 = memref.load %arg3[%c3_11] : memref<5xf32, #tpu.memory_space<smem>>
    %43 = vector.broadcast %42 : f32 to vector<1x512xf32>
    %44 = arith.addf %41, %43 : vector<1x512xf32>
    %cst_12 = arith.constant 0.000000e+00 : f32
    %45 = vector.broadcast %cst_12 : f32 to vector<1x512xf32>
    %46 = arith.maximumf %44, %45 : vector<1x512xf32>
    %c3_13 = arith.constant 3 : index
    %47 = memref.load %arg4[%c3_13] : memref<5xf32, #tpu.memory_space<smem>>
    %48 = vector.broadcast %47 : f32 to vector<1x512xf32>
    %49 = arith.mulf %48, %46 : vector<1x512xf32>
    %50 = arith.addf %38, %49 : vector<1x512xf32>
    %c4 = arith.constant 4 : index
    %51 = memref.load %arg2[%c4] : memref<5xf32, #tpu.memory_space<smem>>
    %52 = vector.broadcast %51 : f32 to vector<1x512xf32>
    %53 = arith.mulf %0, %52 : vector<1x512xf32>
    %c4_14 = arith.constant 4 : index
    %54 = memref.load %arg3[%c4_14] : memref<5xf32, #tpu.memory_space<smem>>
    %55 = vector.broadcast %54 : f32 to vector<1x512xf32>
    %56 = arith.addf %53, %55 : vector<1x512xf32>
    %cst_15 = arith.constant 0.000000e+00 : f32
    %57 = vector.broadcast %cst_15 : f32 to vector<1x512xf32>
    %58 = arith.maximumf %56, %57 : vector<1x512xf32>
    %c4_16 = arith.constant 4 : index
    %59 = memref.load %arg4[%c4_16] : memref<5xf32, #tpu.memory_space<smem>>
    %60 = vector.broadcast %59 : f32 to vector<1x512xf32>
    %61 = arith.mulf %60, %58 : vector<1x512xf32>
    %62 = arith.addf %50, %61 : vector<1x512xf32>
    %63 = math.exp %62 : vector<1x512xf32>
    %cst_17 = arith.constant 1.000000e+00 : f32
    %64 = vector.broadcast %cst_17 : f32 to vector<1x512xf32>
    %65 = arith.addf %64, %63 : vector<1x512xf32>
    %66 = tpu.reciprocal %65 {approx = true} : vector<1x512xf32> -> vector<1x512xf32>
    %c0_18 = arith.constant 0 : index
    %c0_19 = arith.constant 0 : index
    %67 = vector.load %arg6[%c0_18, %c0_19] : memref<1x512xf32, #tpu.memory_space<vmem>>, vector<1x512xf32>
    tpu.vector_store %arg6[%c0_18, %c0_19], %66 {strides = array<i32>} : memref<1x512xf32, #tpu.memory_space<vmem>>, vector<1x512xf32>,
    return
  }
  func.func @transform_0(%arg0: i32) -> (i32, i32) {
    %c0_i32 = arith.constant 0 : i32
    %c0_i32_0 = arith.constant 0 : i32
    return %arg0, %c0_i32 : i32, i32
  }
  func.func @transform_1(%arg0: i32) -> i32 {
    %c0_i32 = arith.constant 0 : i32
    %c0_i32_0 = arith.constant 0 : i32
    return %c0_i32 : i32
  }
  func.func @transform_2(%arg0: i32) -> i32 {
    %c0_i32 = arith.constant 0 : i32
    %c0_i32_0 = arith.constant 0 : i32
    return %c0_i32 : i32
  }
  func.func @transform_3(%arg0: i32) -> i32 {
    %c0_i32 = arith.constant 0 : i32
    %c0_i32_0 = arith.constant 0 : i32
    return %c0_i32 : i32
  }
  func.func @transform_4(%arg0: i32) -> i32 {
    %c0_i32 = arith.constant 0 : i32
    %c0_i32_0 = arith.constant 0 : i32
    return %c0_i32 : i32
  }
  func.func @transform_5(%arg0: i32) -> (i32, i32) {
    %c0_i32 = arith.constant 0 : i32
    %c0_i32_0 = arith.constant 0 : i32
    return %arg0, %c0_i32 : i32, i32
  }
}

</mosaic_0001>

<bundles_post_ra>
// kernel: tpu_custom_call.1
= control target key start
LH: loop header
LB: loop body
LE: loop exit
PB: predicated region body
PF: predicated region fallthrough
CT: control target
= control target key end

     0   :  { %11 = vsyncpa [#allocation4], 0  ;;  %s318_s0 = inlined_call_operand.hbm [shape: f32[1,512], index: 0, kind: input, shape index: {}]   ;;  %s319_s1 = inlined_call_operand.vmem [shape: f32[5], index: 1, kind: input, shape index: {}]   ;;  %s320_s2 = inlined_call_operand.vmem [shape: f32[5], index: 2, kind: input, shape index: {}]   ;;  %s321_s3 = inlined_call_operand.vmem [shape: f32[5], index: 3, kind: input, shape index: {}]   ;;  %s322_s4 = inlined_call_operand.<no memory space> [shape: f32[1], index: 4, kind: input, shape index: {}]   ;;  %s323_s5 = inlined_call_operand.hbm [shape: f32[1,512], index: 5, kind: output, shape index: {}]  }
   0x1   :  { %12 = vsyncpa [#allocation6], 0 }
   0x2   :  { %13 = vsyncpa [#allocation9], 0  ;;  %s41_s20 = sshll.u32 %s320_s2, 4  ;;  %s42_s20 = int_to_ptr.vmem [resolvable:$true] %s41_s20 }
   0x3   :  { %14 = vsyncpa [#allocation5], 0  ;;  %s175_s21 = scalar_lea.vmem %s42_s20, 16  ;;  %p180_p1 = scmp.lt.s32.totalorder %s42_s20, %s42_s20 }
   0x4   :  { %p176_p0 = scmp.ne.s32.totalorder %s42_s20, %s175_s21  ;;  %p181_p2 = scmp.lt.s32.totalorder %s175_s21, %s175_s21 }
   0x6   :  { %p182_p3 = por %p181_p2, %p180_p1 }
   0x8   :  { %p183_p4 = pnand %p182_p3, %p176_p0 }
   0xa   :  { %186 = shalt.err (!%p183_p4)
}
   0xb   :  { %s259_s22 = smov [#allocation8]   ;;  %s260_s23 = smov [#allocation3]  }
   0xc   :  { %44 = dma.vmem_to_smem %s42_s20, 16, %s259_s22, [#allocation9]  }
   0xd   :  { %s21_s24 = sshll.u32 %s260_s23, 4  ;;  %s31_s27 = sshll.u32 %s319_s1, 4  ;;  %s22_s24 = int_to_ptr.vmem [resolvable:$true] %s21_s24  ;;  %s32_s27 = int_to_ptr.vmem [resolvable:$true] %s31_s27 }
   0xe   :  { %s195_s2 = scalar_lea.vmem %s22_s24, 64  ;;  %p200_p6 = scmp.lt.s32.totalorder %s22_s24, %s22_s24 }
   0xf   :  { %p196_p5 = scmp.ne.s32.totalorder %s22_s24, %s195_s2  ;;  %p201_p7 = scmp.lt.s32.totalorder %s195_s2, %s195_s2 }
  0x11   :  { %p202_p8 = por %p201_p7, %p200_p6 }
  0x13   :  { %p203_p9 = pnand %p202_p8, %p196_p5 }
  0x15   :  { %206 = shalt.err (!%p203_p9)
}
  0x16   :  { %24 = dma.hbm_to_vmem [thread:$0]  %s318_s0, 64, %s22_s24, [#allocation4]  }
  0x17   :  { %s51_s7 = sshll.u32 %s321_s3, 4  ;;  %s207_s8 = scalar_lea.vmem %s32_s27, 16  ;;  %s52_s7 = int_to_ptr.vmem [resolvable:$true] %s51_s7 }
  0x18   :  { %p208_p10 = scmp.ne.s32.totalorder %s32_s27, %s207_s8  ;;  %p212_p11 = scmp.lt.s32.totalorder %s32_s27, %s32_s27 }
  0x19   :  { %p213_p12 = scmp.lt.s32.totalorder %s207_s8, %s207_s8 }
  0x1b   :  { %p214_p13 = por %p213_p12, %p212_p11 }
  0x1d   :  { %p215_p0 = pnand %p214_p13, %p208_p10 }
  0x1f   :  { %218 = shalt.err (!%p215_p0)
}
  0x20   :  { %s261_s1 = smov [#allocation7]   ;;  %s219_s9 = scalar_lea.vmem %s52_s7, 16 }
  0x21   :  { %34 = dma.vmem_to_smem %s32_s27, 16, %s261_s1, [#allocation6]  }
  0x22   :  { %p220_p1 = scmp.ne.s32.totalorder %s52_s7, %s219_s9  ;;  %p224_p2 = scmp.lt.s32.totalorder %s52_s7, %s52_s7 }
  0x23   :  { %p225_p3 = scmp.lt.s32.totalorder %s219_s9, %s219_s9 }
  0x25   :  { %p226_p4 = por %p225_p3, %p224_p2 }
  0x27   :  { %p227_p5 = pnand %p226_p4, %p220_p1 }
  0x29   :  { %230 = shalt.err (!%p227_p5)
}
  0x2a   :  { %s262_s0 = smov [#allocation10]  }
  0x2b   :  { %54 = dma.vmem_to_smem %s52_s7, 16, %s262_s0, [#allocation9]  }
  0x2c   :  { %251 = dma.done.wait [#allocation4], 64  }
  0x2d   :  { %252 = vsyncadd [#allocation4], 4294967232 }
  0x2e   :  { %253 = dma.done.wait [#allocation6], 16  }
  0x2f   :  { %254 = vsyncadd [#allocation6], 4294967280 }
  0x30   :  { %255 = dma.done.wait [#allocation9], 32  }
  0x31   :  { %256 = vsyncadd [#allocation9], 4294967264 }
  0x32   :  { %69 = sfence }
  0x33   :  { %s71_s3 = sld [smem:[#allocation7]]  ;;  %v70_v0 = vld [vmem:[#allocation3] sm:$0xf]  ;;  %v82_v10 = vstv %s322_s4  ;;  %v132_v45 = vlaneseq  ;;  %s263_s4 = smov [#allocation11]  }
  0x34   :  { %s74_s10 = sld [smem:[#allocation8]]  ;;  %s143_s26 = sshll.u32 %s263_s4, 4  ;;  %s144_s26 = int_to_ptr.vmem [resolvable:$true] %s143_s26 }
  0x35   :  { %s78_s11 = sld [smem:[#allocation10]]  ;;  %vm134_vm0 = vcmp.lt.s32.totalorder %v132_v45, 512  ;;  %s231_s27 = scalar_lea.vmem %s144_s26, 64 }
  0x36   :  { %s154_s12 = sld [smem:[#allocation7 + $0x1]]  ;;  %p232_p6 = scmp.ne.s32.totalorder %s144_s26, %s231_s27 }
  0x37   :  { %s155_s13 = sld [smem:[#allocation8 + $0x1]]  ;;  %p236_p7 = scmp.lt.s32.totalorder %s144_s26, %s144_s26 }
  0x38   :  { %s306_s14 = sld [smem:[#allocation10 + $0x1]]  ;;  %p237_p8 = scmp.lt.s32.totalorder %s231_s27, %s231_s27 }
  0x39   :  { %v72_v1 = vstv %s71_s3  ;;  %s157_s15 = sld [smem:[#allocation7 + $0x2]] }
  0x3a   :  { %v73_v2 = vmul.f32 %v72_v1, %v70_v0  ;;  %v75_v3 = vstv %s74_s10  ;;  %s158_s16 = sld [smem:[#allocation8 + $0x2]]  ;;  %p238_p9 = por %p237_p8, %p236_p7 }
  0x3b   :  { %s308_s17 = sld [smem:[#allocation10 + $0x2]]  ;;  %v79_v6 = vstv %s78_s11 }
  0x3c   :  { %v76_v4 = vadd.f32 %v75_v3, %v73_v2  ;;  %v85_v5 = vstv %s154_s12  ;;  %s160_s18 = sld [smem:[#allocation7 + $0x3]]  ;;  %p239_p10 = pnand %p238_p9, %p232_p6 }
  0x3d   :  { %v86_v7 = vmul.f32 %v85_v5, %v70_v0  ;;  %v88_v8 = vstv %s155_s13  ;;  %s161_s19 = sld [smem:[#allocation8 + $0x3]] }
  0x3e   :  { %v77_v9 = vmax.f32 %v76_v4, 0.0  ;;  %s162_s20 = sld [smem:[#allocation10 + $0x3]]  ;;  %v92_v14 = vstv %s306_s14 }
  0x3f   :  { %v89_v11 = vadd.f32 %v88_v8, %v86_v7  ;;  %v96_v12 = vstv %s157_s15  ;;  %s163_s23 = sld [smem:[#allocation7 + $0x4]] }
  0x40   :  { %v80_v13 = vmul.f32 %v79_v6, %v77_v9  ;;  %v97_v15 = vmul.f32 %v96_v12, %v70_v0  ;;  %v99_v16 = vstv %s158_s16  ;;  %s164_s24 = sld [smem:[#allocation8 + $0x4]] }
  0x41   :  { %v90_v17 = vmax.f32 %v89_v11, 0.0  ;;  %s165_s25 = sld [smem:[#allocation10 + $0x4]]  ;;  %v103_v22 = vstv %s308_s17 }
  0x42   :  { %v83_v18 = vadd.f32 %v82_v10, %v80_v13  ;;  %v100_v19 = vadd.f32 %v99_v16, %v97_v15  ;;  %v107_v20 = vstv %s160_s18 }
  0x43   :  { %v93_v21 = vmul.f32 %v92_v14, %v90_v17  ;;  %v108_v23 = vmul.f32 %v107_v20, %v70_v0  ;;  %v110_v24 = vstv %s161_s19 }
  0x44   :  { %v101_v25 = vmax.f32 %v100_v19, 0.0  ;;  %v114_v30 = vstv %s162_s20 }
  0x45   :  { %v94_v26 = vadd.f32 %v93_v21, %v83_v18  ;;  %v111_v27 = vadd.f32 %v110_v24, %v108_v23  ;;  %v118_v28 = vstv %s163_s23 }
  0x46   :  { %v104_v29 = vmul.f32 %v103_v22, %v101_v25  ;;  %v119_v31 = vmul.f32 %v118_v28, %v70_v0  ;;  %v121_v32 = vstv %s164_s24 }
  0x47   :  { %v112_v33 = vmax.f32 %v111_v27, 0.0  ;;  %v125_v37 = vstv %s165_s25 }
  0x48   :  { %v105_v34 = vadd.f32 %v104_v29, %v94_v26  ;;  %v122_v35 = vadd.f32 %v121_v32, %v119_v31 }
  0x49   :  { %v115_v36 = vmul.f32 %v114_v30, %v112_v33 }
  0x4a   :  { %v123_v38 = vmax.f32 %v122_v35, 0.0 }
  0x4b   :  { %v116_v39 = vadd.f32 %v115_v36, %v105_v34 }
  0x4c   :  { %v126_v40 = vmul.f32 %v125_v37, %v123_v38 }
  0x4e   :  { %v127_v41 = vadd.f32 %v126_v40, %v116_v39 }
  0x50   :  { %v128_v42 = vmul.f32 1.442695, %v127_v41 }
  0x52   :  { %171 = vpow2.f32 %v128_v42 }
  0x5f   :  { %v172_v43 = vpop.eup %171 }
  0x60   :  { %v130_v44 = vadd.f32 1.0, %v172_v43 }
  0x62   :  { %173 = vrcp.f32 %v130_v44 }
  0x6f   :  { %v174_v46 = vpop.eup %173 }
  0x70   :  { %136 = vst.msk [vmem:[#allocation11] sm:$0xf] %vm134_vm0, %v174_v46 }
  0x71   :  { %242 = shalt.err (!%p239_p10)
}
  0x72   :  { %146 = dma.vmem_to_hbm [thread:$0]  %s144_s26, 64, %s323_s5, [#allocation5]  }
  0x73   :  { %257 = dma.done.wait [#allocation5], 64  }
  0x74   :  { %258 = vsyncadd [#allocation5], 4294967232 }
  0x75   :  { %150 = vsyncpa [#allocation4], 1 }
  0x76   :  { %151 = vsyncpa [#allocation5], 1 }
  0x77   :  { %152 = vsyncpa [#allocation6], 1 }
  0x78   :  { %153 = vsyncpa [#allocation9], 1 }

</bundles_post_ra>
